<compile_context>
chip_gen: v7x
topology: tpu7x:2x2x1
jax: 0.10.0
libtpu: 0.0.40
codegen_flags: <defaults>
</compile_context>

<pallas_src>
import jax
import jax.numpy as jnp
from jax.experimental import pallas as pl
from jax.experimental.pallas import tpu as pltpu

_NEG_SLOPE = 0.1  # nn.LeakyReLU(negative_slope=0.1)


def _mlp_kernel(x_ref, w_ref, b_ref, o_ref):
    # x: (tile_rows, F_in), w: (F_in, tile_n), b: (1, tile_n), o: (tile_rows, tile_n)
    y = jnp.dot(x_ref[...], w_ref[...], preferred_element_type=jnp.float32)
    y = y + b_ref[...]
    y = jnp.where(y >= 0, y, _NEG_SLOPE * y)
    o_ref[...] = y.astype(o_ref.dtype)


def _mlp_kernel_masked(x_ref, w_ref, b_ref, m_ref, o_ref):
    # Same as above plus the SharedDropout mask (1, tile_n), broadcast over rows.
    y = jnp.dot(x_ref[...], w_ref[...], preferred_element_type=jnp.float32)
    y = y + b_ref[...]
    y = jnp.where(y >= 0, y, _NEG_SLOPE * y)
    o_ref[...] = (y * m_ref[...]).astype(o_ref.dtype)


def _round_up(x, m):
    return (x + m - 1) // m * m


def _fit_tile_rows(tile_rows, f_in, tile_n, in_isz, out_isz, budget, align):
    """Largest row tile (multiple of `align`) whose double-buffered VMEM fits."""
    def vmem_need(t):
        return (2 * t * f_in * in_isz          # x tiles (double-buffered)
                + 2 * t * tile_n * out_isz     # out tiles (double-buffered)
                + 2 * f_in * tile_n * in_isz   # weight block
                + 2 * tile_n * 4)              # bias block
    t = max(align, tile_rows // align * align)
    while t > align and vmem_need(t) > budget:
        t = max(align, (t // 2) // align * align)
    return t


def make_shared_dropout_mask(key, batch, out_features, p, dtype=jnp.float32):
    """SharedDropout (batch_first=True): one mask per batch element, shared
    across the sequence dim, pre-scaled by 1/(1-p). Shape [B, 1, F_out]."""
    keep = 1.0 - p
    m = jax.random.bernoulli(key, keep, (batch, 1, out_features))
    return m.astype(dtype) / keep


def mlp_forward(x, weight, bias, *, dropout_mask=None, tile_m=256, tile_n=512,
                compute_dtype=None, vmem_budget_bytes=12 * 1024 * 1024):
    """Forward pass of MLP.

    x:            [B, S, F_in]
    weight:       [F_out, F_in]  (PyTorch nn.Linear layout)
    bias:         [F_out]
    dropout_mask: optional [B, 1, F_out] pre-scaled SharedDropout mask
                  (training mode). None -> eval mode (identity dropout).
    compute_dtype: optionally jnp.bfloat16 to feed the MXU bf16 x/W
                  (accumulation stays f32; output dtype = x.dtype).
    """
    B, S, F_in = x.shape
    F_out = weight.shape[0]
    out_dtype = x.dtype

    in_dtype = compute_dtype if compute_dtype is not None else x.dtype
    in_isz = jnp.dtype(in_dtype).itemsize
    out_isz = jnp.dtype(out_dtype).itemsize
    align = 16 if in_isz == 2 else 8  # sublane packing (bf16 packs 2/sublane)

    # Lane-dense output: pad F_out to a multiple of 128; tile N if large.
    F_out_p = _round_up(F_out, 128)
    tile_n = min(_round_up(tile_n, 128), F_out_p)
    while F_out_p % tile_n:
        tile_n -= 128

    w_t = weight.T  # [F_in, F_out]
    bias_p = bias
    if F_out_p != F_out:
        w_t = jnp.pad(w_t, ((0, 0), (0, F_out_p - F_out)))
        bias_p = jnp.pad(bias, (0, F_out_p - F_out))
    w_t = w_t.astype(in_dtype)
    b2d = bias_p.reshape(1, F_out_p).astype(jnp.float32)

    vmem_limit = 64 * 1024 * 1024  # fits v5e/v6e (128 MiB) and v7x (64 MiB)

    if dropout_mask is None:
        # ---------------- eval mode: no mask operand at all ----------------
        M = B * S
        tile_rows = min(_round_up(tile_m, align), _round_up(M, align))
        tile_rows = _fit_tile_rows(tile_rows, F_in, tile_n, in_isz, out_isz,
                                   vmem_budget_bytes, align)
        M_pad = _round_up(M, tile_rows)

        x2d = x.reshape(M, F_in).astype(in_dtype)
        if M_pad != M:
            x2d = jnp.pad(x2d, ((0, M_pad - M), (0, 0)))

        grid = (M_pad // tile_rows, F_out_p // tile_n)
        out2d = pl.pallas_call(
            _mlp_kernel,
            out_shape=jax.ShapeDtypeStruct((M_pad, F_out_p), out_dtype),
            grid_spec=pltpu.PrefetchScalarGridSpec(
                num_scalar_prefetch=0,
                grid=grid,
                in_specs=[
                    pl.BlockSpec((tile_rows, F_in), lambda i, j: (i, 0)),
                    pl.BlockSpec((F_in, tile_n), lambda i, j: (0, j)),
                    pl.BlockSpec((1, tile_n), lambda i, j: (0, j)),
                ],
                out_specs=pl.BlockSpec((tile_rows, tile_n),
                                       lambda i, j: (i, j)),
            ),
            compiler_params=pltpu.CompilerParams(
                dimension_semantics=("parallel", "parallel"),
                vmem_limit_bytes=vmem_limit),
            cost_estimate=pl.CostEstimate(
                flops=2 * M_pad * F_in * F_out_p,
                transcendentals=0,
                bytes_accessed=(M_pad * F_in * in_isz
                                + F_in * F_out_p * in_isz
                                + M_pad * F_out_p * out_isz)),
        )(x2d, w_t, b2d)
        return out2d[:M, :F_out].reshape(B, S, F_out)

    # ---------------- training mode: mask stays [B, 1, F_out] ----------------
    assert dropout_mask.shape == (B, 1, F_out)
    mask_p = dropout_mask.astype(jnp.float32)
    if F_out_p != F_out:
        mask_p = jnp.pad(mask_p, ((0, 0), (0, 0), (0, F_out_p - F_out)))

    tile_s = min(_round_up(tile_m, align), _round_up(S, align))
    tile_s = _fit_tile_rows(tile_s, F_in, tile_n, in_isz, out_isz,
                            vmem_budget_bytes, align)
    S_pad = _round_up(S, tile_s)

    x3d = x.astype(in_dtype)
    if S_pad != S:
        x3d = jnp.pad(x3d, ((0, 0), (0, S_pad - S), (0, 0)))

    grid = (B, S_pad // tile_s, F_out_p // tile_n)
    out3d = pl.pallas_call(
        _mlp_kernel_masked,
        out_shape=jax.ShapeDtypeStruct((B, S_pad, F_out_p), out_dtype),
        grid_spec=pltpu.PrefetchScalarGridSpec(
            num_scalar_prefetch=0,
            grid=grid,
            in_specs=[
                pl.BlockSpec((None, tile_s, F_in), lambda b, s, j: (b, s, 0)),
                pl.BlockSpec((F_in, tile_n), lambda b, s, j: (0, j)),
                pl.BlockSpec((1, tile_n), lambda b, s, j: (0, j)),
                pl.BlockSpec((None, 1, tile_n), lambda b, s, j: (b, 0, j)),
            ],
            out_specs=pl.BlockSpec((None, tile_s, tile_n),
                                   lambda b, s, j: (b, s, j)),
        ),
        compiler_params=pltpu.CompilerParams(
            dimension_semantics=("parallel", "parallel", "parallel"),
            vmem_limit_bytes=vmem_limit),
        cost_estimate=pl.CostEstimate(
            flops=2 * B * S_pad * F_in * F_out_p,
            transcendentals=0,
            bytes_accessed=(B * S_pad * F_in * in_isz
                            + F_in * F_out_p * in_isz
                            + B * F_out_p * 4
                            + B * S_pad * F_out_p * out_isz)),
    )(x3d, w_t, b2d, mask_p)
    return out3d[:, :S, :F_out]


def init_mlp_params(key, in_features, out_features, dtype=jnp.float32):
    # nn.init.orthogonal_(self.linear.weight); nn.init.zeros_(self.linear.bias)
    weight = jax.nn.initializers.orthogonal()(key, (out_features, in_features),
                                              dtype)
    bias = jnp.zeros((out_features,), dtype)
    return weight, bias


if __name__ == "__main__":
    # Small shapes consistent with dparser usage: [batch, seq, hidden].
    B, S, F_in, F_out = 2, 8, 32, 32
    key = jax.random.PRNGKey(0)
    k_x, k_w, k_drop = jax.random.split(key, 3)

    x = jax.random.normal(k_x, (B, S, F_in), dtype=jnp.float32)
    weight, bias = init_mlp_params(k_w, F_in, F_out)

    # Pure-JAX reference (linear + LeakyReLU 0.1).
    ref = x @ weight.T + bias
    ref = jnp.where(ref >= 0, ref, 0.1 * ref)

    # --- eval mode (module.eval(): dropout is identity; no mask operand) ---
    out_eval = jax.block_until_ready(mlp_forward(x, weight, bias))
    assert out_eval.shape == (B, S, F_out)
    assert jnp.allclose(out_eval, ref, atol=1e-5, rtol=1e-5)

    # --- training mode (SharedDropout p=0.5, mask shared across seq dim) ---
    # TODO(synk): the mask is generated with jax.random in the wrapper (glue);
    # the kernel applies it shared across the sequence dim, matching
    # SharedDropout(batch_first=True).
    mask = make_shared_dropout_mask(k_drop, B, F_out, p=0.5)
    out_train = jax.block_until_ready(
        mlp_forward(x, weight, bias, dropout_mask=mask))
    assert out_train.shape == (B, S, F_out)
    assert jnp.allclose(out_train, ref * mask, atol=1e-5, rtol=1e-5)

    print("KERNEL_OK")
</pallas_src>

<mosaic_0001>
module attributes {stable_mosaic.version = 11 : i64} {
  func.func @_mlp_kernel(%arg0: i32, %arg1: i32, %arg2: memref<16x32xf32, #tpu.memory_space<vmem>>, %arg3: memref<32x128xf32, #tpu.memory_space<vmem>>, %arg4: memref<1x128xf32, #tpu.memory_space<vmem>>, %arg5: memref<16x128xf32, #tpu.memory_space<vmem>>) attributes {dimension_semantics = [#tpu.dimension_semantics<parallel>, #tpu.dimension_semantics<parallel>], iteration_bounds = array<i64: 1, 1>, scalar_prefetch = 0 : i64, scratch_operands = 0 : i64, tpu.core_type = #tpu.core_type<tc>, window_params = [{transform_indices = @transform_0, window_bounds = array<i64: 16, 32>}, {transform_indices = @transform_1, window_bounds = array<i64: 32, 128>}, {transform_indices = @transform_2, window_bounds = array<i64: 1, 128>}, {transform_indices = @transform_3, window_bounds = array<i64: 16, 128>}]} {
    %c0 = arith.constant 0 : index
    %c0_0 = arith.constant 0 : index
    %0 = vector.load %arg2[%c0, %c0_0] : memref<16x32xf32, #tpu.memory_space<vmem>>, vector<16x32xf32>
    %c0_1 = arith.constant 0 : index
    %c0_2 = arith.constant 0 : index
    %1 = vector.load %arg3[%c0_1, %c0_2] : memref<32x128xf32, #tpu.memory_space<vmem>>, vector<32x128xf32>
    %cst = arith.constant dense<0.000000e+00> : vector<16x128xf32>
    %2 = tpu.matmul %0, %1, %cst {dimension_numbers = #tpu.dot_dimension_numbers<[1], [0], [0], [1], [0, 0, 1, 1], [], []>} : vector<16x32xf32>, vector<32x128xf32>, vector<16x128xf32> -> vector<16x128xf32>
    %c0_3 = arith.constant 0 : index
    %c0_4 = arith.constant 0 : index
    %3 = vector.load %arg4[%c0_3, %c0_4] : memref<1x128xf32, #tpu.memory_space<vmem>>, vector<1x128xf32>
    %4 = vector.broadcast %3 : vector<1x128xf32> to vector<16x128xf32>
    %5 = arith.addf %2, %4 : vector<16x128xf32>
    %cst_5 = arith.constant 0.000000e+00 : f32
    %6 = vector.broadcast %cst_5 : f32 to vector<16x128xf32>
    %7 = arith.cmpf oge, %5, %6 : vector<16x128xf32>
    %cst_6 = arith.constant 1.000000e-01 : f32
    %8 = vector.broadcast %cst_6 : f32 to vector<16x128xf32>
    %9 = arith.mulf %8, %5 : vector<16x128xf32>
    %10 = arith.select %7, %5, %9 : vector<16x128xi1>, vector<16x128xf32>
    %c0_7 = arith.constant 0 : index
    %c0_8 = arith.constant 0 : index
    %11 = vector.load %arg5[%c0_7, %c0_8] : memref<16x128xf32, #tpu.memory_space<vmem>>, vector<16x128xf32>
    tpu.vector_store %arg5[%c0_7, %c0_8], %10 {strides = array<i32>} : memref<16x128xf32, #tpu.memory_space<vmem>>, vector<16x128xf32>,
    return
  }
  func.func @transform_0(%arg0: i32, %arg1: i32) -> (i32, i32) {
    %c0_i32 = arith.constant 0 : i32
    %c0_i32_0 = arith.constant 0 : i32
    return %arg0, %c0_i32 : i32, i32
  }
  func.func @transform_1(%arg0: i32, %arg1: i32) -> (i32, i32) {
    %c0_i32 = arith.constant 0 : i32
    %c0_i32_0 = arith.constant 0 : i32
    return %c0_i32, %arg1 : i32, i32
  }
  func.func @transform_2(%arg0: i32, %arg1: i32) -> (i32, i32) {
    %c0_i32 = arith.constant 0 : i32
    %c0_i32_0 = arith.constant 0 : i32
    return %c0_i32, %arg1 : i32, i32
  }
  func.func @transform_3(%arg0: i32, %arg1: i32) -> (i32, i32) {
    %c0_i32 = arith.constant 0 : i32
    return %arg0, %arg1 : i32, i32
  }
}

</mosaic_0001>

<bundles_post_ra>
// kernel: tpu_custom_call.1
= control target key start
LH: loop header
LB: loop body
LE: loop exit
PB: predicated region body
PF: predicated region fallthrough
CT: control target
= control target key end

     0   :  { %8 = vsyncpa [#allocation3], 0  ;;  %s393_s0 = inlined_call_operand.hbm [shape: f32[16,32], index: 0, kind: input, shape index: {}]   ;;  %s394_s1 = inlined_call_operand.hbm [shape: f32[32,128], index: 1, kind: input, shape index: {}]   ;;  %s395_s2 = inlined_call_operand.hbm [shape: f32[1,128], index: 2, kind: input, shape index: {}]   ;;  %s396_s3 = inlined_call_operand.hbm [shape: f32[16,128], index: 3, kind: output, shape index: {}]  }
   0x1   :  { %9 = vsyncpa [#allocation6], 0 }
   0x2   :  { %10 = vsyncpa [#allocation4], 0  ;;  %s303_s12 = smov [#allocation5]   ;;  %s304_s14 = smov [#allocation2]  }
   0x3   :  { %s28_s13 = sshll.u32 %s303_s12, 4  ;;  %s16_s15 = sshll.u32 %s304_s14, 4  ;;  %s29_s13 = int_to_ptr.vmem [resolvable:$true] %s28_s13  ;;  %s329_s15 = int_to_ptr.vmem [resolvable:$true] %s16_s15 }
   0x4   :  { %s209_s18 = scalar_lea.hbm %s394_s1, 512 }
   0x5   :  { %p210_p0 = scmp.ne.s32.totalorder %s394_s1, %s209_s18  ;;  %p213_p1 = scmp.lt.u32.totalorder %s209_s18, %s394_s1 }
   0x7   :  { %p215_p2 = pnand %p213_p1, %p210_p0 }
   0x9   :  { %218 = shalt.err (!%p215_p2)
}
   0xa   :  { %s219_s23 = scalar_lea.vmem %s29_s13, 512  ;;  %p224_p4 = scmp.lt.s32.totalorder %s29_s13, %s29_s13 }
   0xb   :  { %p220_p3 = scmp.ne.s32.totalorder %s29_s13, %s219_s23  ;;  %p225_p5 = scmp.lt.s32.totalorder %s219_s23, %s219_s23 }
   0xd   :  { %p226_p6 = por %p225_p5, %p224_p4 }
   0xf   :  { %p227_p7 = pnand %p226_p6, %p220_p3 }
  0x11   :  { %230 = shalt.err (!%p227_p7)
}
  0x12   :  { %s305_s24 = smov 128   ;;  %s306_s25 = smov 8  }
  0x13   :  { %34 = dma.hbm_to_vmem [thread:$0]  %s394_s1, 512, %s29_s13, [#allocation6], %s305_s24, %s305_s24, %s306_s25  }
  0x14   :  { %s231_s30 = scalar_lea.hbm %s393_s0, 256 }
  0x15   :  { %p232_p8 = scmp.ne.s32.totalorder %s393_s0, %s231_s30  ;;  %p235_p9 = scmp.lt.u32.totalorder %s231_s30, %s393_s0 }
  0x17   :  { %p237_p10 = pnand %p235_p9, %p232_p8 }
  0x19   :  { %240 = shalt.err (!%p237_p10)
}
  0x1a   :  { %s241_s8 = scalar_lea.vmem %s329_s15, 256  ;;  %p246_p12 = scmp.lt.s32.totalorder %s329_s15, %s329_s15 }
  0x1b   :  { %p242_p11 = scmp.ne.s32.totalorder %s329_s15, %s241_s8  ;;  %p247_p13 = scmp.lt.s32.totalorder %s241_s8, %s241_s8 }
  0x1d   :  { %p248_p0 = por %p247_p13, %p246_p12 }
  0x1f   :  { %p249_p1 = pnand %p248_p0, %p242_p11 }
  0x21   :  { %252 = shalt.err (!%p249_p1)
}
  0x22   :  { %22 = dma.hbm_to_vmem [thread:$0]  %s393_s0, 256, %s329_s15, [#allocation3], %s305_s24, %s305_s24, %s306_s25  }
  0x23   :  { %s307_s10 = smov [#allocation7]   ;;  %s253_s14 = scalar_lea.hbm %s395_s2, 16 }
  0x24   :  { %s41_s11 = sshll.u32 %s307_s10, 4  ;;  %p254_p2 = scmp.ne.s32.totalorder %s395_s2, %s253_s14  ;;  %s42_s11 = int_to_ptr.vmem [resolvable:$true] %s41_s11 }
  0x25   :  { %p257_p3 = scmp.lt.u32.totalorder %s253_s14, %s395_s2 }
  0x27   :  { %p259_p4 = pnand %p257_p3, %p254_p2 }
  0x29   :  { %262 = shalt.err (!%p259_p4)
}
  0x2a   :  { %s263_s20 = scalar_lea.vmem %s42_s11, 16  ;;  %s267_s0 = scalar_lea.vmem %s42_s11, 32 }
  0x2b   :  { %p264_p5 = scmp.ne.s32.totalorder %s42_s11, %s263_s20  ;;  %p268_p6 = scmp.lt.s32.totalorder %s42_s11, %s42_s11 }
  0x2c   :  { %p269_p7 = scmp.lt.s32.totalorder %s267_s0, %s263_s20 }
  0x2e   :  { %p270_p8 = por %p269_p7, %p268_p6 }
  0x30   :  { %p271_p9 = pnand %p270_p8, %p264_p5 }
  0x32   :  { %274 = shalt.err (!%p271_p9)
}
  0x33   :  { %44 = dma.hbm_to_vmem [thread:$0]  %s395_s2, 16, %s42_s11, [#allocation6]  }
  0x34   :  { %297 = dma.done.wait [#allocation3], 256  }
  0x35   :  { %298 = vsyncadd [#allocation3], 4294967040 }
  0x36   :  { %299 = dma.done.wait [#allocation6], 528  }
  0x37   :  { %300 = vsyncadd [#allocation6], 4294966768  ;;  %vm67_vm0 = vcmask 261120   ;;  %v56_v0 = vld [vmem:[#allocation5] sm:$0xff]  ;;  %v57_v1 = vld [vmem:[#allocation5 + $0x8] sm:$0xff]  ;;  %s308_s2 = smov [#allocation8]  }
  0x38   :  { %v58_v2 = vld [vmem:[#allocation5 + $0x10] sm:$0xff]  ;;  %v195_v3 = vpack.c.bf16 %v57_v1, %v56_v0  ;;  %v59_v4 = vld [vmem:[#allocation5 + $0x18] sm:$0xff]  ;;  %v175_v8 = vld [vmem:[#allocation7] ss:$0 sm:$0xff]  ;;  %s162_s22 = sshll.u32 %s308_s2, 4  ;;  %s163_s22 = int_to_ptr.vmem [resolvable:$true] %s162_s22 }
  0x39   :  { %v54_v5 = vld [vmem:[#allocation2] sm:$0xff]  ;;  %v199_v6 = vpack.c.bf16 %v59_v4, %v58_v2  ;;  %v55_v7 = vld [vmem:[#allocation2 + $0x8] sm:$0xff]  ;;  %s275_s23 = scalar_lea.vmem %s163_s22, 256  ;;  %p280_p11 = scmp.lt.s32.totalorder %s163_s22, %s163_s22 }
  0x3a   :  { %192 = vmatprep.mubr.msk.f32.mxu0 %vm67_vm0, %v54_v5  ;;  %196 = vmatprep.subr.bf16.mxu0 %v195_v3  ;;  %p276_p10 = scmp.ne.s32.totalorder %s163_s22, %s275_s23  ;;  %p281_p12 = scmp.lt.s32.totalorder %s275_s23, %s275_s23 }
  0x3b   :  { %198 = vmatpush3.bf16.msra.mxu0 %v195_v3 }
  0x3c   :  { %200 = vmatprep.subr.bf16.mxu0 %v199_v6  ;;  %p282_p13 = por %p281_p12, %p280_p11 }
  0x3e   :  { %p283_p0 = pnand %p282_p13, %p276_p10 }
  0x3f   :  { %202 = vmatpush3.bf16.msra.mxu0 %v199_v6 }
  0x42   :  { %193 = vmatmul.mubr.msk.f32.vlgmr.msra.gmra.mrb[0].mxu0 %vm67_vm0, %v55_v7 }
 0x115   :  { %v194_v9 = vpop.f32.mrb[0].mxu0 }
 0x116   :  { %v146_v10 = vadd.f32 %v194_v9, %v175_v8  ;;  %v140_v11 = vpop.f32.mrb[1].mxu0 }
 0x117   :  { %v141_v12 = vadd.f32 %v175_v8, %v140_v11 }
 0x118   :  { %vm150_vm1 = vcmp.ge.f32.partialorder %v146_v10, 0.0  ;;  %v152_v13 = vmul.f32 0.1, %v146_v10 }
 0x119   :  { %vm149_vm2 = vcmp.ge.f32.partialorder %v141_v12, 0.0  ;;  %v151_v14 = vmul.f32 0.1, %v141_v12 }
 0x11a   :  { %v154_v15 = vsel %vm150_vm1, %v146_v10, %v152_v13 }
 0x11b   :  { %v153_v16 = vsel %vm149_vm2, %v141_v12, %v151_v14  ;;  %156 = vst [vmem:[#allocation8 + $0x8] sm:$0xff] %v154_v15 }
 0x11c   :  { %155 = vst [vmem:[#allocation8] sm:$0xff] %v153_v16 }
 0x11d   :  { %286 = shalt.err (!%p283_p0)
}
 0x11e   :  { %s287_s28 = scalar_lea.hbm %s396_s3, 256 }
 0x11f   :  { %p288_p1 = scmp.ne.s32.totalorder %s396_s3, %s287_s28  ;;  %p291_p2 = scmp.lt.u32.totalorder %s287_s28, %s396_s3 }
 0x121   :  { %p293_p3 = pnand %p291_p2, %p288_p1 }
 0x123   :  { %296 = shalt.err (!%p293_p3)
}
 0x124   :  { %168 = dma.vmem_to_hbm [thread:$0]  %s163_s22, 256, %s396_s3, [#allocation4], %s305_s24, %s305_s24, %s306_s25  }
 0x125   :  { %301 = dma.done.wait [#allocation4], 256  }
 0x126   :  { %302 = vsyncadd [#allocation4], 4294967040 }
 0x127   :  { %172 = vsyncpa [#allocation3], 1 }
 0x128   :  { %173 = vsyncpa [#allocation6], 1 }
 0x129   :  { %174 = vsyncpa [#allocation4], 1 }

</bundles_post_ra>
